<compile_context>
chip_gen: v7x
topology: tpu7x:2x2x1
jax: 0.10.0
libtpu: 0.0.40
codegen_flags: <defaults>
</compile_context>

<pallas_src>
import jax
import jax.numpy as jnp
from jax import lax
from jax.experimental import pallas as pl
from jax.experimental.pallas import tpu as pltpu  # noqa: F401  (TPU backend)


def _modulation_kernel(d_ref, t_ref, w_ref, b_ref, od_ref, ot_ref):
    """Both prompt sets through the same Linear in one kernel invocation.

    d: (Md, D), t: (Mt, D), w: (D, D) PyTorch layout (out, in), b: (1, D)
    y = x @ W.T + b, computed as dot_general contracting dim 1 of x with dim 1
    of W (no wrapper-side transpose), f32 accumulation on the MXU.
    """
    w = w_ref[...]
    b = b_ref[...]
    dn = (((1,), (1,)), ((), ()))  # x.dim1 · w.dim1  ==  x @ W.T
    yd = lax.dot_general(d_ref[...], w, dimension_numbers=dn,
                         preferred_element_type=jnp.float32)
    yt = lax.dot_general(t_ref[...], w, dimension_numbers=dn,
                         preferred_element_type=jnp.float32)
    od_ref[...] = (yd + b).astype(od_ref.dtype)
    ot_ref[...] = (yt + b).astype(ot_ref.dtype)


def modulation_forward(domain_prompt, task_prompt, weight, bias2d):
    """One pallas_call, two inputs, two outputs. No grid (single-block)."""
    Md, D = domain_prompt.shape
    Mt, _ = task_prompt.shape
    out_d, out_t = pl.pallas_call(
        _modulation_kernel,
        out_shape=(
            jax.ShapeDtypeStruct((Md, D), domain_prompt.dtype),
            jax.ShapeDtypeStruct((Mt, D), task_prompt.dtype),
        ),
        in_specs=[
            pl.BlockSpec((Md, D), lambda: (0, 0)),
            pl.BlockSpec((Mt, D), lambda: (0, 0)),
            pl.BlockSpec((D, D), lambda: (0, 0)),
            pl.BlockSpec((1, D), lambda: (0, 0)),
        ],
        out_specs=(
            pl.BlockSpec((Md, D), lambda: (0, 0)),
            pl.BlockSpec((Mt, D), lambda: (0, 0)),
        ),
    )(domain_prompt, task_prompt, weight, bias2d)
    return out_d, out_t


class SimpleModulationNetworkPallas:
    def __init__(self, prompt_dim, num_layers, key):
        self.num_layers = num_layers
        self.prompt_dim = prompt_dim
        # nn.Linear default init: U(-1/sqrt(D), 1/sqrt(D)); weight kept in
        # PyTorch (out_features, in_features) layout — no transpose ever needed.
        kw, kb = jax.random.split(key)
        bound = 1.0 / jnp.sqrt(jnp.float32(prompt_dim))
        self.weight = jax.random.uniform(
            kw, (prompt_dim, prompt_dim), jnp.float32, -bound, bound)
        self.bias = jax.random.uniform(
            kb, (prompt_dim,), jnp.float32, -bound, bound)
        # Hoisted: broadcast-row form of the bias, built once.
        self.bias2d = self.bias.reshape(1, prompt_dim)

    def __call__(self, domain_prompt, task_prompt):
        mod_domain, mod_task = modulation_forward(
            domain_prompt, task_prompt, self.weight, self.bias2d)
        # The PyTorch loop re-applies the same layer to the same inputs each
        # iteration, so every list entry is identical (JAX arrays are immutable,
        # aliasing is safe).
        modulated_domain_prompts = [mod_domain for _ in range(self.num_layers)]
        modulated_task_prompts = [mod_task for _ in range(self.num_layers)]
        return modulated_domain_prompts, modulated_task_prompts


if __name__ == "__main__":
    prompt_dim = 32
    num_layers = 3
    n_domain_prompts = 4
    n_task_prompts = 8

    key = jax.random.PRNGKey(0)
    k_params, k_dom, k_task = jax.random.split(key, 3)

    net = SimpleModulationNetworkPallas(prompt_dim, num_layers, k_params)

    domain_prompt = jax.random.normal(
        k_dom, (n_domain_prompts, prompt_dim), jnp.float32)
    task_prompt = jax.random.normal(
        k_task, (n_task_prompts, prompt_dim), jnp.float32)

    dom_outs, task_outs = net(domain_prompt, task_prompt)
    jax.block_until_ready(dom_outs[-1])
    jax.block_until_ready(task_outs[-1])

    # Reference check against plain JAX (y = x @ W.T + b)
    ref_dom = domain_prompt @ net.weight.T + net.bias
    ref_task = task_prompt @ net.weight.T + net.bias
    assert len(dom_outs) == num_layers and len(task_outs) == num_layers
    for d, t in zip(dom_outs, task_outs):
        assert jnp.allclose(d, ref_dom, atol=1e-5), "domain mismatch"
        assert jnp.allclose(t, ref_task, atol=1e-5), "task mismatch"

    print("KERNEL_OK")
</pallas_src>

<mosaic_0001>
module attributes {stable_mosaic.version = 11 : i64} {
  func.func @_modulation_kernel(%arg0: memref<4x32xf32, #tpu.memory_space<vmem>>, %arg1: memref<8x32xf32, #tpu.memory_space<vmem>>, %arg2: memref<32x32xf32, #tpu.memory_space<vmem>>, %arg3: memref<1x32xf32, #tpu.memory_space<vmem>>, %arg4: memref<4x32xf32, #tpu.memory_space<vmem>>, %arg5: memref<8x32xf32, #tpu.memory_space<vmem>>) attributes {dimension_semantics = [], scalar_prefetch = 0 : i64, scratch_operands = 0 : i64, tpu.core_type = #tpu.core_type<tc>} {
    %c0 = arith.constant 0 : index
    %c0_0 = arith.constant 0 : index
    %0 = vector.load %arg2[%c0, %c0_0] : memref<32x32xf32, #tpu.memory_space<vmem>>, vector<32x32xf32>
    %c0_1 = arith.constant 0 : index
    %c0_2 = arith.constant 0 : index
    %1 = vector.load %arg3[%c0_1, %c0_2] : memref<1x32xf32, #tpu.memory_space<vmem>>, vector<1x32xf32>
    %c0_3 = arith.constant 0 : index
    %c0_4 = arith.constant 0 : index
    %2 = vector.load %arg0[%c0_3, %c0_4] : memref<4x32xf32, #tpu.memory_space<vmem>>, vector<4x32xf32>
    %cst = arith.constant dense<0.000000e+00> : vector<4x32xf32>
    %3 = tpu.matmul %2, %0, %cst {dimension_numbers = #tpu.dot_dimension_numbers<[1], [1], [0], [0], [0, 0, 1, 0], [], []>} : vector<4x32xf32>, vector<32x32xf32>, vector<4x32xf32> -> vector<4x32xf32>
    %c0_5 = arith.constant 0 : index
    %c0_6 = arith.constant 0 : index
    %4 = vector.load %arg1[%c0_5, %c0_6] : memref<8x32xf32, #tpu.memory_space<vmem>>, vector<8x32xf32>
    %cst_7 = arith.constant dense<0.000000e+00> : vector<8x32xf32>
    %5 = tpu.matmul %4, %0, %cst_7 {dimension_numbers = #tpu.dot_dimension_numbers<[1], [1], [0], [0], [0, 0, 1, 0], [], []>} : vector<8x32xf32>, vector<32x32xf32>, vector<8x32xf32> -> vector<8x32xf32>
    %6 = vector.broadcast %1 : vector<1x32xf32> to vector<4x32xf32>
    %7 = arith.addf %3, %6 : vector<4x32xf32>
    %c0_8 = arith.constant 0 : index
    %c0_9 = arith.constant 0 : index
    %8 = vector.load %arg4[%c0_8, %c0_9] : memref<4x32xf32, #tpu.memory_space<vmem>>, vector<4x32xf32>
    tpu.vector_store %arg4[%c0_8, %c0_9], %7 {strides = array<i32>} : memref<4x32xf32, #tpu.memory_space<vmem>>, vector<4x32xf32>,
    %9 = vector.broadcast %1 : vector<1x32xf32> to vector<8x32xf32>
    %10 = arith.addf %5, %9 : vector<8x32xf32>
    %c0_10 = arith.constant 0 : index
    %c0_11 = arith.constant 0 : index
    %11 = vector.load %arg5[%c0_10, %c0_11] : memref<8x32xf32, #tpu.memory_space<vmem>>, vector<8x32xf32>
    tpu.vector_store %arg5[%c0_10, %c0_11], %10 {strides = array<i32>} : memref<8x32xf32, #tpu.memory_space<vmem>>, vector<8x32xf32>,
    return
  }
}

</mosaic_0001>

<bundles_post_ra>
// kernel: tpu_custom_call.1
= control target key start
LH: loop header
LB: loop body
LE: loop exit
PB: predicated region body
PF: predicated region fallthrough
CT: control target
= control target key end

     0   :  { %11 = vsyncpa [#allocation3], 0  ;;  %s558_s0 = inlined_call_operand.hbm [shape: f32[4,32], index: 0, kind: input, shape index: {}]   ;;  %s559_s1 = inlined_call_operand.hbm [shape: f32[8,32], index: 1, kind: input, shape index: {}]   ;;  %s560_s2 = inlined_call_operand.hbm [shape: f32[32,32], index: 2, kind: input, shape index: {}]   ;;  %s561_s3 = inlined_call_operand.vmem [shape: f32[1,32], index: 3, kind: input, shape index: {}]   ;;  %s562_s4 = inlined_call_operand.hbm [shape: f32[4,32], index: 4, kind: output, shape index: {0}]   ;;  %s563_s5 = inlined_call_operand.hbm [shape: f32[8,32], index: 5, kind: output, shape index: {1}]  }
   0x1   :  { %12 = vsyncpa [#allocation6], 0 }
   0x2   :  { %13 = vsyncpa [#allocation4], 0 }
   0x3   :  { %14 = vsyncpa [#allocation10], 0  ;;  %s450_s18 = smov [#allocation5]   ;;  %s451_s20 = smov [#allocation2]  }
   0x4   :  { %s31_s19 = sshll.u32 %s450_s18, 4  ;;  %s21_s21 = sshll.u32 %s451_s20, 4  ;;  %s32_s19 = int_to_ptr.vmem [resolvable:$true] %s31_s19  ;;  %s22_s21 = int_to_ptr.vmem [resolvable:$true] %s21_s21 }
   0x5   :  { %s332_s24 = scalar_lea.hbm %s559_s1, 128 }
   0x6   :  { %p333_p0 = scmp.ne.s32.totalorder %s559_s1, %s332_s24  ;;  %p336_p1 = scmp.lt.u32.totalorder %s332_s24, %s559_s1 }
   0x8   :  { %p338_p2 = pnand %p336_p1, %p333_p0 }
   0xa   :  { %341 = shalt.err (!%p338_p2)
}
   0xb   :  { %s342_s29 = scalar_lea.vmem %s32_s19, 128  ;;  %p347_p4 = scmp.lt.s32.totalorder %s32_s19, %s32_s19 }
   0xc   :  { %p343_p3 = scmp.ne.s32.totalorder %s32_s19, %s342_s29  ;;  %p348_p5 = scmp.lt.s32.totalorder %s342_s29, %s342_s29 }
   0xe   :  { %p349_p6 = por %p348_p5, %p347_p4 }
  0x10   :  { %p350_p7 = pnand %p349_p6, %p343_p3 }
  0x12   :  { %353 = shalt.err (!%p350_p7)
}
  0x13   :  { %34 = dma.hbm_to_vmem [thread:$0]  %s559_s1, 128, %s32_s19, [#allocation6]  }
  0x14   :  { %s354_s9 = scalar_lea.hbm %s558_s0, 64 }
  0x15   :  { %p355_p8 = scmp.ne.s32.totalorder %s558_s0, %s354_s9  ;;  %p358_p9 = scmp.lt.u32.totalorder %s354_s9, %s558_s0 }
  0x17   :  { %p360_p10 = pnand %p358_p9, %p355_p8 }
  0x19   :  { %363 = shalt.err (!%p360_p10)
}
  0x1a   :  { %s364_s14 = scalar_lea.vmem %s22_s21, 64  ;;  %p369_p12 = scmp.lt.s32.totalorder %s22_s21, %s22_s21 }
  0x1b   :  { %p365_p11 = scmp.ne.s32.totalorder %s22_s21, %s364_s14  ;;  %p370_p13 = scmp.lt.s32.totalorder %s364_s14, %s364_s14 }
  0x1d   :  { %p371_p0 = por %p370_p13, %p369_p12 }
  0x1f   :  { %p372_p1 = pnand %p371_p0, %p365_p11 }
  0x21   :  { %375 = shalt.err (!%p372_p1)
}
  0x22   :  { %24 = dma.hbm_to_vmem [thread:$0]  %s558_s0, 64, %s22_s21, [#allocation3]  }
  0x23   :  { %s452_s16 = smov [#allocation7]   ;;  %s376_s20 = scalar_lea.hbm %s560_s2, 512 }
  0x24   :  { %s40_s17 = sshll.u32 %s452_s16, 4  ;;  %p377_p2 = scmp.ne.s32.totalorder %s560_s2, %s376_s20  ;;  %s41_s17 = int_to_ptr.vmem [resolvable:$true] %s40_s17 }
  0x25   :  { %p380_p3 = scmp.lt.u32.totalorder %s376_s20, %s560_s2 }
  0x27   :  { %p382_p4 = pnand %p380_p3, %p377_p2 }
  0x29   :  { %385 = shalt.err (!%p382_p4)
}
  0x2a   :  { %s386_s26 = scalar_lea.vmem %s41_s17, 512  ;;  %p391_p6 = scmp.lt.s32.totalorder %s41_s17, %s41_s17 }
  0x2b   :  { %p387_p5 = scmp.ne.s32.totalorder %s41_s17, %s386_s26  ;;  %p392_p7 = scmp.lt.s32.totalorder %s386_s26, %s386_s26 }
  0x2d   :  { %p393_p8 = por %p392_p7, %p391_p6 }
  0x2f   :  { %p394_p9 = pnand %p393_p8, %p387_p5 }
  0x31   :  { %397 = shalt.err (!%p394_p9)
}
  0x32   :  { %s453_s0 = smov 128   ;;  %s454_s21 = smov 8  }
  0x33   :  { %46 = dma.hbm_to_vmem [thread:$0]  %s560_s2, 512, %s41_s17, [#allocation6], %s453_s0, %s453_s0, %s454_s21  }
  0x34   :  { %442 = dma.done.wait [#allocation3], 64  }
  0x35   :  { %443 = vsyncadd [#allocation3], 4294967232 }
  0x36   :  { %444 = dma.done.wait [#allocation6], 640  }
  0x37   :  { %445 = vsyncadd [#allocation6], 4294966656  ;;  %v455_v0 = vmov 0.0|0.0   ;;  %vm456_vm0 = vmmov 0   ;;  %v457_v1 = vmov 0.0   ;;  %vm71_vm1 = vcmask 261120  }
  0x38   :  { %306 = vmatprep.subr.bf16.mxu0 %v455_v0  ;;  %314 = vmatprep.subr.bf16.mxu1 %v455_v0  ;;  %v58_v2 = vld [vmem:[#allocation7] sm:$0xff]  ;;  %v59_v3 = vld [vmem:[#allocation7 + $0x8] sm:$0xff]  ;;  %vm308_vm2 = vmpackc.low %vm71_vm1, %vm71_vm1  ;;  %s458_s30 = smov [#allocation8]   ;;  %s459_s7 = smov [#allocation9]   ;;  %vm157_vm3 = vcmask 257024  }
  0x39   :  { %292 = vmatprep.mubr.msk.f32.mxu0 %vm456_vm0, %v457_v1  ;;  %303 = vmatprep.mubr.msk.f32.mxu1 %vm456_vm0, %v457_v1  ;;  %v307_v4 = vpack.c.bf16 %v59_v3, %v58_v2  ;;  %v60_v5 = vld [vmem:[#allocation7 + $0x10] sm:$0xff]  ;;  %v61_v6 = vld [vmem:[#allocation7 + $0x18] sm:$0xff]  ;;  %s239_s6 = sshll.u32 %s458_s30, 4  ;;  %s249_s8 = sshll.u32 %s459_s7, 4  ;;  %s240_s6 = int_to_ptr.vmem [resolvable:$true] %s239_s6  ;;  %s250_s8 = int_to_ptr.vmem [resolvable:$true] %s249_s8 }
  0x3a   :  { %v311_v7 = vpack.c.bf16 %v61_v6, %v60_v5  ;;  %v63_v8 = vld [vmem:[#allocation2] sm:$0xf]  ;;  %v64_v9 = vld [vmem:[#allocation5] sm:$0xff]  ;;  %s398_s9 = scalar_lea.vmem %s240_s6, 64  ;;  %p403_p11 = scmp.lt.s32.totalorder %s240_s6, %s240_s6 }
  0x3b   :  { %309 = vmatpush3.bf16.xpose.msk.msra.mxu0 %vm308_vm2, %v307_v4  ;;  %317 = vmatpush3.bf16.xpose.msk.msra.mxu1 %vm308_vm2, %v307_v4  ;;  %v263_v10 = vld [vmem:[%s561_s3] ss:$0 sm:$0xff]  ;;  %p399_p10 = scmp.ne.s32.totalorder %s240_s6, %s398_s9  ;;  %p404_p12 = scmp.lt.s32.totalorder %s398_s9, %s398_s9 }
  0x3c   :  { %310 = vmatprep.subr.bf16.mxu0 %v455_v0  ;;  %318 = vmatprep.subr.bf16.mxu1 %v455_v0 }
  0x3d   :  { %p405_p13 = por %p404_p12, %p403_p11 }
  0x3f   :  { %p406_p0 = pnand %p405_p13, %p399_p10 }
  0x43   :  { %313 = vmatpush3.bf16.xpose.msk.msra.mxu0 %vm308_vm2, %v311_v7  ;;  %321 = vmatpush3.bf16.xpose.msk.msra.mxu1 %vm308_vm2, %v311_v7 }
  0x4a   :  { %293 = vmatmul.mubr.msk.f32.vlgmr.msra.gmra.mrb[0].mxu0 %vm71_vm1, %v63_v8  ;;  %304 = vmatmul.mubr.msk.f32.vlgmr.msra.gmra.mrb[0].mxu1 %vm71_vm1, %v64_v9 }
 0x11d   :  { %v153_v11 = vpop.f32.mrb[0].mxu0  ;;  %v228_v12 = vpop.f32.mrb[0].mxu1 }
 0x11e   :  { %v154_v13 = vadd.f32 %v263_v10, %v153_v11  ;;  %v229_v14 = vadd.f32 %v263_v10, %v228_v12  ;;  %v294_v15 = vpop.f32.mrb[1].mxu0  ;;  %v305_v16 = vpop.f32.mrb[1].mxu1 }
 0x120   :  { %232 = vst.msk [vmem:[#allocation9] sm:$0xff] %vm71_vm1, %v229_v14 }
 0x121   :  { %158 = vst.msk [vmem:[#allocation8] sm:$0xf] %vm157_vm3, %v154_v13 }
 0x122   :  { %409 = shalt.err (!%p406_p0)
}
 0x123   :  { %s410_s11 = scalar_lea.hbm %s562_s4, 64 }
 0x124   :  { %p411_p1 = scmp.ne.s32.totalorder %s562_s4, %s410_s11  ;;  %p414_p2 = scmp.lt.u32.totalorder %s410_s11, %s562_s4 }
 0x126   :  { %p416_p3 = pnand %p414_p2, %p411_p1 }
 0x128   :  { %419 = shalt.err (!%p416_p3)
}
 0x129   :  { %242 = dma.vmem_to_hbm [thread:$0]  %s240_s6, 64, %s562_s4, [#allocation4]  }
 0x12a   :  { %s420_s17 = scalar_lea.vmem %s250_s8, 128  ;;  %p425_p5 = scmp.lt.s32.totalorder %s250_s8, %s250_s8 }
 0x12b   :  { %p421_p4 = scmp.ne.s32.totalorder %s250_s8, %s420_s17  ;;  %p426_p6 = scmp.lt.s32.totalorder %s420_s17, %s420_s17 }
 0x12d   :  { %p427_p7 = por %p426_p6, %p425_p5 }
 0x12f   :  { %p428_p8 = pnand %p427_p7, %p421_p4 }
 0x131   :  { %431 = shalt.err (!%p428_p8)
}
 0x132   :  { %s432_s20 = scalar_lea.hbm %s563_s5, 128 }
 0x133   :  { %p433_p9 = scmp.ne.s32.totalorder %s563_s5, %s432_s20  ;;  %p436_p10 = scmp.lt.u32.totalorder %s432_s20, %s563_s5 }
 0x135   :  { %p438_p11 = pnand %p436_p10, %p433_p9 }
 0x137   :  { %441 = shalt.err (!%p438_p11)
}
 0x138   :  { %252 = dma.vmem_to_hbm [thread:$0]  %s250_s8, 128, %s563_s5, [#allocation10]  }
 0x139   :  { %446 = dma.done.wait [#allocation4], 64  }
 0x13a   :  { %447 = vsyncadd [#allocation4], 4294967232 }
 0x13b   :  { %448 = dma.done.wait [#allocation10], 128  }
 0x13c   :  { %449 = vsyncadd [#allocation10], 4294967168 }
 0x13d   :  { %259 = vsyncpa [#allocation3], 1 }
 0x13e   :  { %260 = vsyncpa [#allocation6], 1 }
 0x13f   :  { %261 = vsyncpa [#allocation4], 1 }
 0x140   :  { %262 = vsyncpa [#allocation10], 1 }

</bundles_post_ra>
